<compile_context>
chip_gen: v7x
topology: tpu7x:2x2x1
jax: 0.10.0
libtpu: 0.0.40
codegen_flags: <defaults>
</compile_context>

<pallas_src>
import jax
import jax.numpy as jnp
from jax.experimental import pallas as pl
from jax.experimental.pallas import tpu as pltpu

INPUTSIZE = 14
H_DIM = 10
Z_DIM = 2
OUT_W = INPUTSIZE + 2 * Z_DIM  # 18: [xr | mu | log_var]


def _align8(n):
    return -(-n // 8) * 8


# Row offsets inside the packed parameter buffer (all starts 8-aligned).
W1_OFF = 0                                   # [14, 10]  fc1.weight^T
B1_OFF = W1_OFF + _align8(INPUTSIZE)         # 16        fc1.bias
W23_OFF = B1_OFF + 8                         # 24        [10, 4] fused fc2^T || fc3^T
B23_OFF = W23_OFF + _align8(H_DIM)           # 40        fused fc2.bias || fc3.bias
W4_OFF = B23_OFF + 8                         # 48        [2, 10] fc4.weight^T
B4_OFF = W4_OFF + _align8(Z_DIM)             # 56        fc4.bias
W5_OFF = B4_OFF + 8                          # 64        [10, 14] fc5.weight^T
B5_OFF = W5_OFF + _align8(H_DIM)             # 80        fc5.bias
P_ROWS = B5_OFF + 8                          # 88
P_COLS = max(H_DIM, 2 * Z_DIM, INPUTSIZE)    # 14


def vae_kernel(x_ref, eps_ref, p_ref, out_ref):
    x = x_ref[...]        # [TB, 14]
    eps = eps_ref[...]    # [TB, 2]

    # Static slices of the packed, VMEM-resident parameter buffer.
    w1 = p_ref[W1_OFF:W1_OFF + INPUTSIZE, 0:H_DIM]          # [14, 10]
    b1 = p_ref[B1_OFF:B1_OFF + 1, 0:H_DIM]                  # [1, 10]
    w23 = p_ref[W23_OFF:W23_OFF + H_DIM, 0:2 * Z_DIM]       # [10, 4]
    b23 = p_ref[B23_OFF:B23_OFF + 1, 0:2 * Z_DIM]           # [1, 4]
    w4 = p_ref[W4_OFF:W4_OFF + Z_DIM, 0:H_DIM]              # [2, 10]
    b4 = p_ref[B4_OFF:B4_OFF + 1, 0:H_DIM]                  # [1, 10]
    w5 = p_ref[W5_OFF:W5_OFF + H_DIM, 0:INPUTSIZE]          # [10, 14]
    b5 = p_ref[B5_OFF:B5_OFF + 1, 0:INPUTSIZE]              # [1, 14]

    # encode (fc2/fc3 fused into one head)
    h = jnp.maximum(jnp.dot(x, w1, preferred_element_type=jnp.float32) + b1, 0.0)
    mulv = jnp.dot(h, w23, preferred_element_type=jnp.float32) + b23     # [TB, 4]
    mu = mulv[:, 0:Z_DIM]
    log_var = mulv[:, Z_DIM:2 * Z_DIM]

    # reparameterize: z = mu + eps * exp(log_var / 2)
    z = mu + eps * jnp.exp(log_var * 0.5)

    # decode
    h2 = jnp.maximum(jnp.dot(z, w4, preferred_element_type=jnp.float32) + b4, 0.0)
    xr = jnp.dot(h2, w5, preferred_element_type=jnp.float32) + b5        # [TB, 14]

    # Single lane-contiguous output slab: [xr | mu | log_var]
    out_ref[:, 0:INPUTSIZE] = xr
    out_ref[:, INPUTSIZE:INPUTSIZE + Z_DIM] = mu
    out_ref[:, INPUTSIZE + Z_DIM:OUT_W] = log_var


def init_params(key, inputsize=INPUTSIZE, h_dim=H_DIM, z_dim=Z_DIM):
    """Deterministic init mimicking nn.Linear defaults (uniform +- 1/sqrt(fan_in)).
    Weights stored in PyTorch convention [out, in]."""
    dims = [(h_dim, inputsize),   # fc1
            (z_dim, h_dim),       # fc2
            (z_dim, h_dim),       # fc3
            (h_dim, z_dim),       # fc4
            (inputsize, h_dim)]   # fc5
    params = {}
    keys = jax.random.split(key, 2 * len(dims))
    for i, (out_d, in_d) in enumerate(dims):
        bound = 1.0 / jnp.sqrt(jnp.float32(in_d))
        w = jax.random.uniform(keys[2 * i], (out_d, in_d),
                               minval=-bound, maxval=bound, dtype=jnp.float32)
        b = jax.random.uniform(keys[2 * i + 1], (out_d,),
                               minval=-bound, maxval=bound, dtype=jnp.float32)
        params[f"w{i+1}"] = w
        params[f"b{i+1}"] = b
    return params


def pack_params(params):
    """Hoisted, one-time prep: transpose to [in, out], fuse fc2/fc3, and pack all
    weights + biases into a single [P_ROWS, P_COLS] f32 buffer."""
    def put(buf, row, arr):
        r, c = arr.shape
        return buf.at[row:row + r, 0:c].set(arr)

    w23 = jnp.concatenate([params["w2"].T, params["w3"].T], axis=1)     # [10, 4]
    b23 = jnp.concatenate([params["b2"], params["b3"]])[None, :]        # [1, 4]

    p = jnp.zeros((P_ROWS, P_COLS), jnp.float32)
    p = put(p, W1_OFF, params["w1"].T)
    p = put(p, B1_OFF, params["b1"][None, :])
    p = put(p, W23_OFF, w23)
    p = put(p, B23_OFF, b23)
    p = put(p, W4_OFF, params["w4"].T)
    p = put(p, B4_OFF, params["b4"][None, :])
    p = put(p, W5_OFF, params["w5"].T)
    p = put(p, B5_OFF, params["b5"][None, :])
    return p


def vae_forward(x, eps, packed_params, *, tb=1024):
    B, F = x.shape
    assert F == INPUTSIZE and eps.shape == (B, Z_DIM)

    # Batch tile: multiple of 8 sublanes, capped (sized for v7x's smaller VMEM too).
    TB = min(tb, _align8(B))
    assert TB % 8 == 0
    Bp = -(-B // TB) * TB
    if Bp != B:
        x = jnp.pad(x, ((0, Bp - B), (0, 0)))
        eps = jnp.pad(eps, ((0, Bp - B), (0, 0)))

    out = pl.pallas_call(
        vae_kernel,
        out_shape=jax.ShapeDtypeStruct((Bp, OUT_W), jnp.float32),
        grid_spec=pltpu.PrefetchScalarGridSpec(
            num_scalar_prefetch=0,
            grid=(Bp // TB,),
            in_specs=[
                pl.BlockSpec((TB, INPUTSIZE), lambda i: (i, 0)),
                pl.BlockSpec((TB, Z_DIM), lambda i: (i, 0)),
                # params: constant index_map -> DMA'd once, stays VMEM-resident
                pl.BlockSpec((P_ROWS, P_COLS), lambda i: (0, 0)),
            ],
            out_specs=pl.BlockSpec((TB, OUT_W), lambda i: (i, 0)),
        ),
        compiler_params=pltpu.CompilerParams(
            dimension_semantics=("parallel",)),
    )(x, eps, packed_params)

    out = out[:B]
    xr = out[:, 0:INPUTSIZE]
    mu = out[:, INPUTSIZE:INPUTSIZE + Z_DIM]
    log_var = out[:, INPUTSIZE + Z_DIM:OUT_W]
    return xr, mu, log_var


def vae_forward_ref(x, eps, params):
    # pure-JAX reference for correctness checking
    h = jax.nn.relu(x @ params["w1"].T + params["b1"])
    mu = h @ params["w2"].T + params["b2"]
    log_var = h @ params["w3"].T + params["b3"]
    z = mu + eps * jnp.exp(log_var / 2.0)
    h2 = jax.nn.relu(z @ params["w4"].T + params["b4"])
    xr = h2 @ params["w5"].T + params["b5"]
    return xr, mu, log_var


def _check(x, eps, packed, params, **kw):
    xr, mu, lv = vae_forward(x, eps, packed, **kw)
    jax.block_until_ready((xr, mu, lv))
    xr_r, mu_r, lv_r = vae_forward_ref(x, eps, params)
    assert jnp.allclose(xr, xr_r, atol=1e-5, rtol=1e-5)
    assert jnp.allclose(mu, mu_r, atol=1e-5, rtol=1e-5)
    assert jnp.allclose(lv, lv_r, atol=1e-5, rtol=1e-5)


if __name__ == "__main__":
    key = jax.random.PRNGKey(0)
    kx, keps, kx2, keps2 = jax.random.split(key, 4)

    params = init_params(jax.random.PRNGKey(1))
    packed = pack_params(params)   # hoisted: transposes/fusion/packing done once

    # Test 1: small batch, single grid step.
    B = 8
    x = jax.random.normal(kx, (B, INPUTSIZE), dtype=jnp.float32)
    eps = jax.random.normal(keps, (B, Z_DIM), dtype=jnp.float32)
    _check(x, eps, packed, params)

    # Test 2: batch not divisible by the tile -> exercises padding + multi-step grid.
    B2 = 40
    x2 = jax.random.normal(kx2, (B2, INPUTSIZE), dtype=jnp.float32)
    eps2 = jax.random.normal(keps2, (B2, Z_DIM), dtype=jnp.float32)
    _check(x2, eps2, packed, params, tb=16)

    print("KERNEL_OK")
</pallas_src>

<mosaic_0001>
module attributes {stable_mosaic.version = 11 : i64} {
  func.func @vae_kernel(%arg0: i32, %arg1: memref<8x14xf32, #tpu.memory_space<vmem>>, %arg2: memref<8x2xf32, #tpu.memory_space<vmem>>, %arg3: memref<88x14xf32, #tpu.memory_space<vmem>>, %arg4: memref<8x18xf32, #tpu.memory_space<vmem>>) attributes {dimension_semantics = [#tpu.dimension_semantics<parallel>], iteration_bounds = array<i64: 1>, scalar_prefetch = 0 : i64, scratch_operands = 0 : i64, tpu.core_type = #tpu.core_type<tc>, window_params = [{transform_indices = @transform_0, window_bounds = array<i64: 8, 14>}, {transform_indices = @transform_1, window_bounds = array<i64: 8, 2>}, {pipeline_mode = #tpu.pipeline_mode<synchronous>, transform_indices = @transform_2, window_bounds = array<i64: 88, 14>}, {transform_indices = @transform_3, window_bounds = array<i64: 8, 18>}]} {
    %c0 = arith.constant 0 : index
    %c0_0 = arith.constant 0 : index
    %0 = vector.load %arg1[%c0, %c0_0] : memref<8x14xf32, #tpu.memory_space<vmem>>, vector<8x14xf32>
    %c0_1 = arith.constant 0 : index
    %c0_2 = arith.constant 0 : index
    %1 = vector.load %arg2[%c0_1, %c0_2] : memref<8x2xf32, #tpu.memory_space<vmem>>, vector<8x2xf32>
    %c0_3 = arith.constant 0 : index
    %c0_4 = arith.constant 0 : index
    %2 = vector.load %arg3[%c0_3, %c0_4] : memref<88x14xf32, #tpu.memory_space<vmem>>, vector<14x10xf32>
    %c16 = arith.constant 16 : index
    %c0_5 = arith.constant 0 : index
    %3 = vector.load %arg3[%c16, %c0_5] : memref<88x14xf32, #tpu.memory_space<vmem>>, vector<1x10xf32>
    %c24 = arith.constant 24 : index
    %c0_6 = arith.constant 0 : index
    %4 = vector.load %arg3[%c24, %c0_6] : memref<88x14xf32, #tpu.memory_space<vmem>>, vector<10x4xf32>
    %c40 = arith.constant 40 : index
    %c0_7 = arith.constant 0 : index
    %5 = vector.load %arg3[%c40, %c0_7] : memref<88x14xf32, #tpu.memory_space<vmem>>, vector<1x4xf32>
    %c48 = arith.constant 48 : index
    %c0_8 = arith.constant 0 : index
    %6 = vector.load %arg3[%c48, %c0_8] : memref<88x14xf32, #tpu.memory_space<vmem>>, vector<2x10xf32>
    %c56 = arith.constant 56 : index
    %c0_9 = arith.constant 0 : index
    %7 = vector.load %arg3[%c56, %c0_9] : memref<88x14xf32, #tpu.memory_space<vmem>>, vector<1x10xf32>
    %c64 = arith.constant 64 : index
    %c0_10 = arith.constant 0 : index
    %8 = vector.load %arg3[%c64, %c0_10] : memref<88x14xf32, #tpu.memory_space<vmem>>, vector<10x14xf32>
    %c80 = arith.constant 80 : index
    %c0_11 = arith.constant 0 : index
    %9 = vector.load %arg3[%c80, %c0_11] : memref<88x14xf32, #tpu.memory_space<vmem>>, vector<1x14xf32>
    %cst = arith.constant dense<0.000000e+00> : vector<8x10xf32>
    %10 = tpu.matmul %0, %2, %cst {dimension_numbers = #tpu.dot_dimension_numbers<[1], [0], [0], [1], [0, 0, 1, 1], [], []>} : vector<8x14xf32>, vector<14x10xf32>, vector<8x10xf32> -> vector<8x10xf32>
    %11 = vector.broadcast %3 : vector<1x10xf32> to vector<8x10xf32>
    %12 = arith.addf %10, %11 : vector<8x10xf32>
    %cst_12 = arith.constant 0.000000e+00 : f32
    %13 = vector.broadcast %cst_12 : f32 to vector<8x10xf32>
    %14 = arith.maximumf %12, %13 : vector<8x10xf32>
    %cst_13 = arith.constant dense<0.000000e+00> : vector<8x4xf32>
    %15 = tpu.matmul %14, %4, %cst_13 {dimension_numbers = #tpu.dot_dimension_numbers<[1], [0], [0], [1], [0, 0, 1, 1], [], []>} : vector<8x10xf32>, vector<10x4xf32>, vector<8x4xf32> -> vector<8x4xf32>
    %16 = vector.broadcast %5 : vector<1x4xf32> to vector<8x4xf32>
    %17 = arith.addf %15, %16 : vector<8x4xf32>
    %18 = vector.extract_strided_slice %17 {offsets = [0, 0], sizes = [8, 2], strides = [1, 1]} : vector<8x4xf32> to vector<8x2xf32>
    %19 = vector.extract_strided_slice %17 {offsets = [0, 2], sizes = [8, 2], strides = [1, 1]} : vector<8x4xf32> to vector<8x2xf32>
    %cst_14 = arith.constant 5.000000e-01 : f32
    %20 = vector.broadcast %cst_14 : f32 to vector<8x2xf32>
    %21 = arith.mulf %19, %20 : vector<8x2xf32>
    %22 = math.exp %21 : vector<8x2xf32>
    %23 = arith.mulf %1, %22 : vector<8x2xf32>
    %24 = arith.addf %18, %23 : vector<8x2xf32>
    %cst_15 = arith.constant dense<0.000000e+00> : vector<8x10xf32>
    %25 = tpu.matmul %24, %6, %cst_15 {dimension_numbers = #tpu.dot_dimension_numbers<[1], [0], [0], [1], [0, 0, 1, 1], [], []>} : vector<8x2xf32>, vector<2x10xf32>, vector<8x10xf32> -> vector<8x10xf32>
    %26 = vector.broadcast %7 : vector<1x10xf32> to vector<8x10xf32>
    %27 = arith.addf %25, %26 : vector<8x10xf32>
    %cst_16 = arith.constant 0.000000e+00 : f32
    %28 = vector.broadcast %cst_16 : f32 to vector<8x10xf32>
    %29 = arith.maximumf %27, %28 : vector<8x10xf32>
    %cst_17 = arith.constant dense<0.000000e+00> : vector<8x14xf32>
    %30 = tpu.matmul %29, %8, %cst_17 {dimension_numbers = #tpu.dot_dimension_numbers<[1], [0], [0], [1], [0, 0, 1, 1], [], []>} : vector<8x10xf32>, vector<10x14xf32>, vector<8x14xf32> -> vector<8x14xf32>
    %31 = vector.broadcast %9 : vector<1x14xf32> to vector<8x14xf32>
    %32 = arith.addf %30, %31 : vector<8x14xf32>
    %c0_18 = arith.constant 0 : index
    %c0_19 = arith.constant 0 : index
    %33 = vector.load %arg4[%c0_18, %c0_19] : memref<8x18xf32, #tpu.memory_space<vmem>>, vector<8x14xf32>
    tpu.vector_store %arg4[%c0_18, %c0_19], %32 {strides = array<i32>} : memref<8x18xf32, #tpu.memory_space<vmem>>, vector<8x14xf32>,
    %c0_20 = arith.constant 0 : index
    %c14 = arith.constant 14 : index
    %34 = vector.load %arg4[%c0_20, %c14] : memref<8x18xf32, #tpu.memory_space<vmem>>, vector<8x2xf32>
    tpu.vector_store %arg4[%c0_20, %c14], %18 {strides = array<i32>} : memref<8x18xf32, #tpu.memory_space<vmem>>, vector<8x2xf32>,
    %c0_21 = arith.constant 0 : index
    %c16_22 = arith.constant 16 : index
    %35 = vector.load %arg4[%c0_21, %c16_22] : memref<8x18xf32, #tpu.memory_space<vmem>>, vector<8x2xf32>
    tpu.vector_store %arg4[%c0_21, %c16_22], %19 {strides = array<i32>} : memref<8x18xf32, #tpu.memory_space<vmem>>, vector<8x2xf32>,
    return
  }
  func.func @transform_0(%arg0: i32) -> (i32, i32) {
    %c0_i32 = arith.constant 0 : i32
    %c0_i32_0 = arith.constant 0 : i32
    return %arg0, %c0_i32 : i32, i32
  }
  func.func @transform_1(%arg0: i32) -> (i32, i32) {
    %c0_i32 = arith.constant 0 : i32
    %c0_i32_0 = arith.constant 0 : i32
    return %arg0, %c0_i32 : i32, i32
  }
  func.func @transform_2(%arg0: i32) -> (i32, i32) {
    %c0_i32 = arith.constant 0 : i32
    %c0_i32_0 = arith.constant 0 : i32
    %c0_i32_1 = arith.constant 0 : i32
    return %c0_i32, %c0_i32_0 : i32, i32
  }
  func.func @transform_3(%arg0: i32) -> (i32, i32) {
    %c0_i32 = arith.constant 0 : i32
    %c0_i32_0 = arith.constant 0 : i32
    return %arg0, %c0_i32 : i32, i32
  }
}

</mosaic_0001>

<bundles_post_ra>
// kernel: tpu_custom_call.1
= control target key start
LH: loop header
LB: loop body
LE: loop exit
PB: predicated region body
PF: predicated region fallthrough
CT: control target
= control target key end

     0   :  { %vm36_vm0 = vcmask 1045504   ;;  %v481_v2 = vmov 0.0|0.0   ;;  %vm482_vm1 = vmmov 1   ;;  %vm483_vm3 = vmmov 0   ;;  %s579_s0 = inlined_call_operand.vmem [shape: f32[8,14], index: 0, kind: input, shape index: {}]   ;;  %s580_s1 = inlined_call_operand.vmem [shape: f32[8,2], index: 1, kind: input, shape index: {}]   ;;  %s581_s2 = inlined_call_operand.vmem [shape: f32[88,14], index: 2, kind: input, shape index: {}]   ;;  %s582_s3 = inlined_call_operand.hbm [shape: f32[8,18], index: 3, kind: output, shape index: {}]  }
   0x1   :  { %v17_v0 = vld [vmem:[%s581_s2] sm:$0xff]  ;;  %v18_v1 = vld [vmem:[%s581_s2 + $0x8] sm:$0x3f]  ;;  %436 = vmatprep.subr.bf16.mxu0 %v481_v2  ;;  %vm438_vm2 = vmpackc.low %vm36_vm0, %vm482_vm1  ;;  %440 = vmatprep.subr.bf16.mxu1 %v481_v2  ;;  %v484_v4 = vmov 0.0  }
   0x2   :  { %v437_v3 = vpack.c.bf16 %v18_v1, %v17_v0  ;;  %414 = vmatprep.mubr.msk.f32.mxu0 %vm483_vm3, %v484_v4  ;;  %421 = vmatprep.mubr.msk.f32.mxu1 %vm483_vm3, %v484_v4 }
   0x3   :  { %8 = vsyncpa [#allocation3], 0  ;;  %v15_v5 = vld [vmem:[%s579_s0] sm:$0xff]  ;;  %vm32_vm4 = vcmask 113664   ;;  %v20_v6 = vld [vmem:[%s581_s2 + $0x18] sm:$0xff]  ;;  %vm119_vm5 = vcmask 1041408  }
   0x4   :  { %439 = vmatpush3.bf16.msk.msra.mxu0 %vm438_vm2, %v437_v3  ;;  %v21_v7 = vld [vmem:[%s581_s2 + $0x20] sm:$0x3]  ;;  %vm530_vm6 = vmpackc.low %vm119_vm5, %vm482_vm1  ;;  %v387_v10 = vld [vmem:[%s581_s2 + $0x10] ss:$0 sm:$0xff]  ;;  %vm115_vm7 = vcmask 80896   ;;  %s485_s27 = smov 126  }
   0x5   :  { %424 = vmatprep.subr.mxu0 %v484_v4  ;;  %v441_v8 = vpack.c.bf16 %v21_v7, %v20_v6  ;;  %v390_v15 = vld [vmem:[%s581_s2 + $0x28] ss:$0 sm:$0xff]  ;;  %v23_v21 = vld [vmem:[%s581_s2 + $0x30] sm:$0x3]  ;;  %s486_s28 = smov 14   ;;  %v16_v23 = vld [vmem:[%s580_s1] sm:$0xff] }
   0x6   :  { %vm206_vm8 = vcmask 15360   ;;  %v25_v27 = vld [vmem:[%s581_s2 + $0x40] sm:$0xff]  ;;  %v26_v28 = vld [vmem:[%s581_s2 + $0x48] sm:$0x3]  ;;  %v393_v30 = vld [vmem:[%s581_s2 + $0x38] ss:$0 sm:$0xff] }
   0x7   :  { %415 = vmatmul.mubr.msk.f32.vlgmr.msra.gmra.mrb[0].mxu0 %vm32_vm4, %v15_v5  ;;  %443 = vmatpush3.bf16.msk.msra.mxu1 %vm530_vm6, %v441_v8  ;;  %v445_v29 = vpack.c.bf16 %v26_v28, %v25_v27  ;;  %v396_v35 = vld [vmem:[%s581_s2 + $0x50] ss:$0 sm:$0xff]  ;;  %s487_s11 = smov [#allocation2]   ;;  %vm369_vm9 = vcmask 130160   ;;  %vm371_vm10 = vcmask 146560  }
   0x8   :  { %426 = vmatprep.mubr.msk.f32.mxu0 %vm483_vm3, %v484_v4  ;;  %444 = vmatprep.subr.bf16.mxu1 %v481_v2  ;;  %s379_s12 = sshll.u32 %s487_s11, 4  ;;  %s380_s12 = int_to_ptr.vmem [resolvable:$true] %s379_s12 }
   0x9   :  { %425 = vmatpush3.msk.msra.mxu0 %vm119_vm5, %v23_v21  ;;  %s457_s13 = scalar_lea.vmem %s380_s12, 128  ;;  %p462_p1 = scmp.lt.s32.totalorder %s380_s12, %s380_s12 }
   0xa   :  { %p458_p0 = scmp.ne.s32.totalorder %s380_s12, %s457_s13  ;;  %p463_p2 = scmp.lt.s32.totalorder %s457_s13, %s457_s13 }
   0xc   :  { %p464_p3 = por %p463_p2, %p462_p1 }
   0xe   :  { %p465_p4 = pnand %p464_p3, %p458_p0 }
  0xda   :  { %v106_v11 = vpop.f32.mrb[0].mxu0 }
  0xdb   :  { %v107_v12 = vadd.f32 %v387_v10, %v106_v11  ;;  %v416_v13 = vpop.f32.mrb[1].mxu0 }
  0xdd   :  { %v110_v14 = vmax.f32 %v107_v12, 0.0 }
  0xdf   :  { %422 = vmatmul.mubr.msk.f32.vlgmr.msra.gmra.mrb[0].mxu1 %vm115_vm7, %v110_v14 }
  0xe0   :  { %433 = vmatprep.mubr.msk.f32.mxu1 %vm483_vm3, %v484_v4  ;;  %447 = vmatpush3.bf16.msk.msra.mxu1 %vm530_vm6, %v445_v29 }
 0x1b2   :  { %v189_v16 = vpop.f32.mrb[0].mxu1 }
 0x1b3   :  { %v190_v17 = vadd.f32 %v390_v15, %v189_v16  ;;  %v423_v18 = vpop.f32.mrb[1].mxu1 }
 0x1b5   :  { %v193_v19 = vmul.f32 0.5, %v190_v17 }
 0x1b7   :  { %v194_v20 = vmul.f32 1.442695, %v193_v19 }
 0x1b9   :  { %455 = vpow2.f32 %v194_v20 }
 0x1c3   :  { %v456_v22 = vpop.eup %455 }
 0x1c4   :  { %197 = vrot.lane.b32.xlu0 %v456_v22, %s485_s27 }
 0x1c8   :  { %366 = vrot.lane.b32.xlu0 %v190_v17, %s486_s28 }
 0x236   :  { %v198_v24 = vpop.permute.xlu0 %197 }
 0x237   :  { %v200_v25 = vmul.f32 %v198_v24, %v16_v23 }
 0x239   :  { %v201_v26 = vadd.f32 %v200_v25, %v190_v17 }
 0x23a   :  { %v367_v39 = vpop.permute.xlu0 %366 }
 0x23b   :  { %427 = vmatmul.mubr.msk.f32.vlgmr.msra.gmra.mrb[2].mxu0 %vm206_vm8, %v201_v26 }
 0x30e   :  { %v279_v31 = vpop.f32.mrb[2].mxu0 }
 0x30f   :  { %v280_v32 = vadd.f32 %v393_v30, %v279_v31  ;;  %v428_v33 = vpop.f32.mrb[3].mxu0 }
 0x311   :  { %v283_v34 = vmax.f32 %v280_v32, 0.0 }
 0x313   :  { %434 = vmatmul.mubr.msk.f32.vlgmr.msra.gmra.mrb[2].mxu1 %vm115_vm7, %v283_v34 }
 0x3e6   :  { %v360_v36 = vpop.f32.mrb[2].mxu1 }
 0x3e7   :  { %v361_v37 = vadd.f32 %v396_v35, %v360_v36  ;;  %v435_v38 = vpop.f32.mrb[3].mxu1 }
 0x3e9   :  { %364 = vst.msk [vmem:[#allocation2] sm:$0xff] %vm32_vm4, %v361_v37 }
 0x3ea   :  { %370 = vst.msk [vmem:[#allocation2] sm:$0xff] %vm369_vm9, %v367_v39 }
 0x3eb   :  { %372 = vst.msk [vmem:[#allocation2] sm:$0xff] %vm371_vm10, %v367_v39 }
 0x3ec   :  { %468 = shalt.err (!%p465_p4)
}
 0x3ed   :  { %s469_s15 = scalar_lea.hbm %s582_s3, 128 }
 0x3ee   :  { %p470_p5 = scmp.ne.s32.totalorder %s582_s3, %s469_s15  ;;  %p473_p6 = scmp.lt.u32.totalorder %s469_s15, %s582_s3 }
 0x3f0   :  { %p475_p7 = pnand %p473_p6, %p470_p5 }
 0x3f2   :  { %478 = shalt.err (!%p475_p7)
}
 0x3f3   :  { %382 = dma.vmem_to_hbm [thread:$0]  %s380_s12, 128, %s582_s3, [#allocation3]  }
 0x3f4   :  { %479 = dma.done.wait [#allocation3], 128  }
 0x3f5   :  { %480 = vsyncadd [#allocation3], 4294967168 }
 0x3f6   :  { %386 = vsyncpa [#allocation3], 1 }

</bundles_post_ra>
